<compile_context>
chip_gen: v6e
topology: v6e:2x2x1
jax: 0.10.0
libtpu: 0.0.40
codegen_flags: <defaults>
</compile_context>

<pallas_src>
import math
from functools import partial

import jax
import jax.numpy as jnp
from jax.experimental import pallas as pl
from jax.experimental.pallas import tpu as pltpu


# ----------------------------------------------------------------------------
# Kernels
# ----------------------------------------------------------------------------

def _pe_add_kernel(x_ref, pe_ref, o_ref):
    # Eval path: broadcast add only (dropout is identity).
    o_ref[...] = (x_ref[...] + pe_ref[...]).astype(o_ref.dtype)


def _pe_add_dropout_kernel(seed_ref, x_ref, pe_ref, o_ref, *, p, n_cols):
    # Training path: broadcast add + inverted dropout.
    # Counter-based RNG: hash(global element index, seed) -> uint32, keep iff
    # bits >= round(p * 2^32).  Pure VPU integer ops, no TPU PRNG primitives.
    j = pl.program_id(0)          # lane-tile index  (outer, "parallel")
    i = pl.program_id(1)          # batch-tile index (inner, "arbitrary")
    tb, tn = x_ref.shape

    y = x_ref[...] + pe_ref[...]  # (1, TN) pe broadcasts over the TB rows

    rows = jax.lax.broadcasted_iota(jnp.int32, (tb, tn), 0) + i * tb
    cols = jax.lax.broadcasted_iota(jnp.int32, (tb, tn), 1) + j * tn
    h = rows.astype(jnp.uint32) * jnp.uint32(n_cols) + cols.astype(jnp.uint32)
    h = h ^ (seed_ref[0].astype(jnp.uint32) * jnp.uint32(0x9E3779B9))
    # lowbias32 finalizer
    h = h ^ jnp.right_shift(h, jnp.uint32(16))
    h = h * jnp.uint32(0x7FEB352D)
    h = h ^ jnp.right_shift(h, jnp.uint32(15))
    h = h * jnp.uint32(0x846CA68B)
    h = h ^ jnp.right_shift(h, jnp.uint32(16))

    threshold = jnp.uint32(min(int(round(p * (1 << 32))), (1 << 32) - 1))
    keep = h >= threshold                       # P(keep) = 1 - p
    scale = jnp.asarray(1.0 / (1.0 - p), dtype=y.dtype)
    o_ref[...] = jnp.where(keep, y * scale, jnp.zeros_like(y)).astype(o_ref.dtype)


# ----------------------------------------------------------------------------
# Tiling helpers
# ----------------------------------------------------------------------------

def _target_block_bytes():
    """~4 MiB x blocks on v6e/v7x; ~2 MiB on v5e (16 MiB scoped-VMEM default)."""
    try:
        kind = jax.devices()[0].device_kind.lower()
    except Exception:
        kind = ""
    if "v5" in kind:
        return 2 << 20
    return 4 << 20


def _pick_tiles(B, N, itemsize, target_bytes):
    """Pick (batch_tile, lane_tile).

    Batch tile = dtype's sublane packing (8 rows for 4-byte, 16 for 2-byte,
    32 for 1-byte) when it divides B, else full B.  Lane tile is a multiple of
    128 dividing N (N is pre-padded to a multiple of 128 by the wrapper), with
    the x block capped at ~target_bytes so double-buffered x/pe/out fit VMEM.
    """
    pack = 8 * max(1, 4 // max(itemsize, 1))
    TB = pack if (B > pack and B % pack == 0) else B

    max_tn = max(128, (target_bytes // max(TB * itemsize, 1)) // 128 * 128)
    if N <= max_tn:
        return TB, N
    tn = max_tn
    while tn > 128 and N % tn != 0:
        tn -= 128
    return TB, (tn if N % tn == 0 else 128)     # 128 always divides padded N


# ----------------------------------------------------------------------------
# Forward wrapper
# ----------------------------------------------------------------------------

def positional_encoding_forward(x, pe, *, p=0.1, training=False, seed=0):
    """x: [B, L, D], pe: [1, L, D] -> dropout(x + pe) (PyTorch semantics)."""
    B, L, D = x.shape
    assert pe.shape == (1, L, D)
    if pe.dtype != x.dtype:
        pe = pe.astype(x.dtype)    # normally a no-op: build pe in target dtype

    N = L * D
    itemsize = jnp.dtype(x.dtype).itemsize
    x2 = x.reshape(B, N)                        # lane-dense layout
    pe2 = pe.reshape(1, N)

    # Pad the lane axis to a multiple of 128 so stores are full-width and the
    # VMEM tile cap always applies (guards the previous uncapped fallback).
    N_pad = (N + 127) // 128 * 128
    if N_pad != N:
        x2 = jnp.pad(x2, ((0, 0), (0, N_pad - N)))
        pe2 = jnp.pad(pe2, ((0, 0), (0, N_pad - N)))

    TB, TN = _pick_tiles(B, N_pad, itemsize, _target_block_bytes())
    # Lane tiles OUTER (parallel, megacore-shardable), batch tiles INNER
    # (arbitrary): pe's block index (0, j) is constant along the inner axis,
    # so Pallas keeps the pe tile resident instead of re-DMAing it per step.
    grid = (N_pad // TN, B // TB)

    cost = pl.CostEstimate(
        flops=B * N_pad,
        transcendentals=0,
        bytes_accessed=(2 * B * N_pad + N_pad) * itemsize,   # x read + out write + one pe read
    )
    cparams = pltpu.CompilerParams(dimension_semantics=("parallel", "arbitrary"))
    out_shape = jax.ShapeDtypeStruct((B, N_pad), x.dtype)

    if training and p > 0.0:
        seed_arr = jnp.asarray([seed], dtype=jnp.int32)
        kernel = partial(_pe_add_dropout_kernel, p=float(p), n_cols=N_pad)
        y2 = pl.pallas_call(
            kernel,
            out_shape=out_shape,
            grid_spec=pltpu.PrefetchScalarGridSpec(
                num_scalar_prefetch=1,                       # dropout seed in SMEM
                grid=grid,
                in_specs=[
                    pl.BlockSpec((TB, TN), lambda j, i, s: (i, j)),   # x
                    pl.BlockSpec((1, TN), lambda j, i, s: (0, j)),    # pe (resident over batch)
                ],
                out_specs=pl.BlockSpec((TB, TN), lambda j, i, s: (i, j)),
            ),
            compiler_params=cparams,
            cost_estimate=cost,
        )(seed_arr, x2, pe2)
    else:
        y2 = pl.pallas_call(
            _pe_add_kernel,
            out_shape=out_shape,
            grid_spec=pltpu.PrefetchScalarGridSpec(
                num_scalar_prefetch=0,
                grid=grid,
                in_specs=[
                    pl.BlockSpec((TB, TN), lambda j, i: (i, j)),
                    pl.BlockSpec((1, TN), lambda j, i: (0, j)),
                ],
                out_specs=pl.BlockSpec((TB, TN), lambda j, i: (i, j)),
            ),
            compiler_params=cparams,
            cost_estimate=cost,
        )(x2, pe2)

    if N_pad != N:
        y2 = y2[:, :N]
    return y2.reshape(B, L, D)


def make_positional_encoding(d_model, max_len, dtype=jnp.float32):
    """Deterministic pe buffer, identical to the PyTorch __init__ math."""
    position = jnp.arange(max_len, dtype=jnp.float32)[:, None]            # [L, 1]
    div_term = jnp.exp(
        jnp.arange(0, d_model, 2, dtype=jnp.float32) * (-math.log(10000.0) / d_model)
    )                                                                      # [D/2]
    angles = position * div_term                                           # [L, D/2]
    pe = jnp.zeros((max_len, d_model), dtype=jnp.float32)
    pe = pe.at[:, 0::2].set(jnp.sin(angles))
    pe = pe.at[:, 1::2].set(jnp.cos(angles))
    return pe[None].astype(dtype)                                          # [1, L, D]


if __name__ == "__main__":
    # Shapes consistent with forward(): batch=2, max_len=8, d_model=32.
    B, L, D = 2, 8, 32
    dropout_p = 0.1

    key = jax.random.PRNGKey(0)
    x = jax.random.normal(key, (B, L, D), dtype=jnp.float32)
    pe = make_positional_encoding(D, L, dtype=x.dtype)   # built in target dtype
    ref = x + pe

    # Eval mode: dropout is identity -> must match the reference add exactly.
    y_eval = jax.block_until_ready(
        positional_encoding_forward(x, pe, p=dropout_p, training=False)
    )
    assert y_eval.shape == (B, L, D)
    assert y_eval.dtype == x.dtype
    assert jnp.allclose(y_eval, ref, atol=1e-6), "eval-mode mismatch"

    # Training mode: every element is either dropped (exactly 0) or the
    # reference value scaled by 1/(1-p).
    y_train = jax.block_until_ready(
        positional_encoding_forward(x, pe, p=dropout_p, training=True, seed=42)
    )
    assert y_train.shape == (B, L, D)
    scaled = ref / (1.0 - dropout_p)
    ok = jnp.isclose(y_train, 0.0) | jnp.isclose(y_train, scaled, atol=1e-5)
    assert bool(jnp.all(ok)), "training-mode values not in {0, (x+pe)/(1-p)}"
    drop_frac = float(jnp.mean((y_train == 0.0).astype(jnp.float32)))
    assert 0.0 < drop_frac < 0.5, f"dropout fraction {drop_frac} implausible for p={dropout_p}"

    print("KERNEL_OK")
</pallas_src>

<mosaic_0001>
module attributes {stable_mosaic.version = 11 : i64} {
  func.func @_pe_add_kernel(%arg0: i32, %arg1: i32, %arg2: memref<2x256xf32, #tpu.memory_space<vmem>>, %arg3: memref<1x256xf32, #tpu.memory_space<vmem>>, %arg4: memref<2x256xf32, #tpu.memory_space<vmem>>) attributes {dimension_semantics = [#tpu.dimension_semantics<parallel>, #tpu.dimension_semantics<arbitrary>], iteration_bounds = array<i64: 1, 1>, scalar_prefetch = 0 : i64, scratch_operands = 0 : i64, tpu.core_type = #tpu.core_type<tc>, window_params = [{transform_indices = @transform_0, window_bounds = array<i64: 2, 256>}, {transform_indices = @transform_1, window_bounds = array<i64: 1, 256>}, {transform_indices = @transform_2, window_bounds = array<i64: 2, 256>}]} {
    %c0 = arith.constant 0 : index
    %c0_0 = arith.constant 0 : index
    %0 = vector.load %arg2[%c0, %c0_0] : memref<2x256xf32, #tpu.memory_space<vmem>>, vector<2x256xf32>
    %c0_1 = arith.constant 0 : index
    %c0_2 = arith.constant 0 : index
    %1 = vector.load %arg3[%c0_1, %c0_2] : memref<1x256xf32, #tpu.memory_space<vmem>>, vector<1x256xf32>
    %2 = vector.broadcast %1 : vector<1x256xf32> to vector<2x256xf32>
    %3 = arith.addf %0, %2 : vector<2x256xf32>
    %c0_3 = arith.constant 0 : index
    %c0_4 = arith.constant 0 : index
    %4 = vector.load %arg4[%c0_3, %c0_4] : memref<2x256xf32, #tpu.memory_space<vmem>>, vector<2x256xf32>
    tpu.vector_store %arg4[%c0_3, %c0_4], %3 {strides = array<i32>} : memref<2x256xf32, #tpu.memory_space<vmem>>, vector<2x256xf32>,
    return
  }
  func.func @transform_0(%arg0: i32, %arg1: i32) -> (i32, i32) {
    %c0_i32 = arith.constant 0 : i32
    return %arg1, %arg0 : i32, i32
  }
  func.func @transform_1(%arg0: i32, %arg1: i32) -> (i32, i32) {
    %c0_i32 = arith.constant 0 : i32
    %c0_i32_0 = arith.constant 0 : i32
    return %c0_i32, %arg0 : i32, i32
  }
  func.func @transform_2(%arg0: i32, %arg1: i32) -> (i32, i32) {
    %c0_i32 = arith.constant 0 : i32
    return %arg1, %arg0 : i32, i32
  }
}

</mosaic_0001>

<bundles_post_ra>
// kernel: tpu_custom_call.1
= control target key start
LH: loop header
LB: loop body
LE: loop exit
PB: predicated region body
PF: predicated region fallthrough
CT: control target
= control target key end

     0   :  { %7 = vsyncpa [#allocation3], 0  ;;  %s172_s0 = inlined_call_operand.hbm [shape: f32[2,256], index: 0, kind: input, shape index: {}]   ;;  %s173_s1 = inlined_call_operand.hbm [shape: f32[1,256], index: 1, kind: input, shape index: {}]   ;;  %s174_s2 = inlined_call_operand.hbm [shape: f32[2,256], index: 2, kind: output, shape index: {}]  }
   0x1   :  { %8 = vsyncpa [#allocation6], 0 }
   0x2   :  { %9 = vsyncpa [#allocation4], 0  ;;  %s144_s9 = smov [#allocation2]   ;;  %s145_s11 = smov [#allocation5]  }
   0x3   :  { %s16_s10 = sshll.u32 %s144_s9, 4  ;;  %s26_s12 = sshll.u32 %s145_s11, 4  ;;  %s17_s10 = int_to_ptr.vmem [resolvable:$true] %s16_s10  ;;  %s27_s12 = int_to_ptr.vmem [resolvable:$true] %s26_s12 }
   0x4   :  { %s86_s13 = scalar_lea.vmem %s17_s10, 64  ;;  %p91_p1 = scmp.lt.s32.totalorder %s17_s10, %s17_s10 }
   0x5   :  { %p87_p0 = scmp.ne.s32.totalorder %s17_s10, %s86_s13  ;;  %p92_p2 = scmp.lt.s32.totalorder %s86_s13, %s86_s13 }
   0x7   :  { %p93_p3 = por %p92_p2, %p91_p1 }
   0x9   :  { %p94_p4 = pnand %p93_p3, %p87_p0 }
   0xb   :  { %97 = shalt.err (!%p94_p4)
}
   0xc   :  { %19 = dma.hbm_to_vmem [thread:$0]  %s172_s0, 64, %s17_s10, [#allocation3]  }
   0xd   :  { %s106_s16 = scalar_lea.vmem %s27_s12, 32  ;;  %p111_p6 = scmp.lt.s32.totalorder %s27_s12, %s27_s12 }
   0xe   :  { %p107_p5 = scmp.ne.s32.totalorder %s27_s12, %s106_s16  ;;  %p112_p7 = scmp.lt.s32.totalorder %s106_s16, %s106_s16 }
  0x10   :  { %p113_p8 = por %p112_p7, %p111_p6 }
  0x12   :  { %p114_p9 = pnand %p113_p8, %p107_p5 }
  0x14   :  { %117 = shalt.err (!%p114_p9)
}
  0x15   :  { %29 = dma.hbm_to_vmem [thread:$0]  %s173_s1, 32, %s27_s12, [#allocation6]  }
  0x16   :  { %138 = dma.done.wait [#allocation3], 64  }
  0x17   :  { %139 = vsyncadd [#allocation3], 4294967232 }
  0x18   :  { %140 = dma.done.wait [#allocation6], 32  }
  0x19   :  { %141 = vsyncadd [#allocation6], 4294967264  ;;  %v39_v0 = vlaneseq  ;;  %v146_v1 = vmov 1983009808   ;;  %v37_v7 = vld [vmem:[#allocation5] sm:$0x3] }
  0x1a   :  { %v49_v2 = vunpack.c.l.s4 %v146_v1  ;;  %v36_v12 = vld [vmem:[#allocation2] sm:$0xf]  ;;  %s147_s0 = smov [#allocation7]  }
  0x1b   :  { %v40_v3 = vshrl.u32 %v39_v0, 7  ;;  %s64_s19 = sshll.u32 %s147_s0, 4  ;;  %s65_s19 = int_to_ptr.vmem [resolvable:$true] %s64_s19 }
  0x1c   :  { %v50_v6 = vunpack.c.0.s8 %v49_v2  ;;  %s118_s1 = scalar_lea.vmem %s65_s19, 64  ;;  %p123_p11 = scmp.lt.s32.totalorder %s65_s19, %s65_s19 }
  0x1d   :  { %v41_v4 = vsub.s32 0, %v40_v3  ;;  %v45_v5 = vsub.s32 1, %v40_v3  ;;  %p119_p10 = scmp.ne.s32.totalorder %s65_s19, %s118_s1  ;;  %p124_p12 = scmp.lt.s32.totalorder %s118_s1, %s118_s1 }
  0x1e   :  { %v53_v10 = vsub.s32 %v50_v6, %v40_v3 }
  0x1f   :  { %v42_v8 = vrot.slane %v37_v7, %v41_v4  ;;  %v46_v9 = vrot.slane %v37_v7, %v45_v5  ;;  %p125_p13 = por %p124_p12, %p123_p11 }
  0x21   :  { %v47_v11 = vcombine.low %v42_v8, %v46_v9  ;;  %p126_p0 = pnand %p125_p13, %p119_p10 }
  0x23   :  { %v54_v13 = vrot.slane %v47_v11, %v53_v10 }
  0x25   :  { %v56_v14 = vadd.f32 %v54_v13, %v36_v12 }
  0x27   :  { %57 = vst [vmem:[#allocation7] sm:$0xf] %v56_v14 }
  0x28   :  { %129 = shalt.err (!%p126_p0)
}
  0x29   :  { %67 = dma.vmem_to_hbm [thread:$0]  %s65_s19, 64, %s174_s2, [#allocation4]  }
  0x2a   :  { %142 = dma.done.wait [#allocation4], 64  }
  0x2b   :  { %143 = vsyncadd [#allocation4], 4294967232 }
  0x2c   :  { %71 = vsyncpa [#allocation3], 1 }
  0x2d   :  { %72 = vsyncpa [#allocation6], 1 }
  0x2e   :  { %73 = vsyncpa [#allocation4], 1 }

</bundles_post_ra>
